<compile_context>
chip_gen: v7x
topology: tpu7x:2x2x1
jax: 0.10.0
libtpu: 0.0.40
codegen_flags: <defaults>
</compile_context>

<pallas_src>
from functools import partial

import jax
import jax.numpy as jnp
from jax.experimental import pallas as pl
from jax.experimental.pallas import tpu as pltpu

EPS_COMBINE = 2.220446049250313e-16  # np.finfo(float).eps used in SparseDispatcher.combine


# ----------------------- experts + weighted combine kernel ----------------------
def _moe_experts_kernel(x_ref, gates_ref, w1_ref, b1_ref, w2_ref, b2_ref,
                        y_ref, *, num_experts, hidden_size):
    """One row tile: fused fc1 across experts, per-expert fc2 + softmax,
    gate-weighted dense combine (== SparseDispatcher.combine)."""
    H = hidden_size
    x_bf = x_ref[...]                                  # (TM, D) bf16 (cast in wrapper)

    # fc1 of ALL experts at once: (TM, D) @ (D, E*H) -> (TM, E*H), lane dense.
    h_all = jax.lax.dot_general(
        x_bf, w1_ref[...],
        dimension_numbers=(((1,), (0,)), ((), ())),
        preferred_element_type=jnp.float32)
    # +bias, ReLU (dropout p=0 = identity); one bf16 cast for the whole buffer.
    h_all = jnp.maximum(h_all + b1_ref[...], 0.0).astype(jnp.bfloat16)

    gates = gates_ref[...]                             # (TM, E) f32, one padded tile
    acc = jnp.zeros(y_ref.shape, jnp.float32)
    for e in range(num_experts):                       # static unroll, E is small
        h = h_all[:, e * H:(e + 1) * H]                # (TM, H) static bf16 slice
        # fc2: (TM, H) @ (H, D) -> (TM, D)   (dropout p=0 = identity)
        o = jax.lax.dot_general(
            h, w2_ref[e],
            dimension_numbers=(((1,), (0,)), ((), ())),
            preferred_element_type=jnp.float32) + b2_ref[e]
        # exp(log_softmax(o)) == softmax(o) exactly -> skip the lse/log round-trip.
        m = jnp.max(o, axis=1, keepdims=True)          # (TM, 1)
        p = jnp.exp(o - m)                             # (TM, D) numerically safe
        s = jnp.sum(p, axis=1, keepdims=True)          # (TM, 1)
        inv = pl.reciprocal(s, approx=True)            # EUP vrcp, free-ish slot
        # SparseDispatcher.combine: gate-weighted sum of expert softmax outputs.
        acc = acc + (gates[:, e:e + 1] * inv) * p
    # combined[combined == 0] = eps ; combined.log()
    # (softmax outputs are strictly positive, so ==0 only triggers for rows with
    #  all-zero gates, i.e. padding — which is sliced off by the wrapper.)
    acc = jnp.where(acc == 0.0, EPS_COMBINE, acc)
    y_ref[...] = jnp.log(acc)


def moe_experts(x, gates, w1, b1, w2, b2, *, tm=2048):
    """x:(B,D) f32, gates:(B,E) f32, w1:(E,H,D), b1:(E,H), w2:(E,D,H), b2:(E,D)."""
    B, D = x.shape
    E, H, _ = w1.shape

    # --- wrapper-side repacking (layout plumbing, not compute) ---
    x_bf = x.astype(jnp.bfloat16)                             # halve x DMA bytes
    w1_all = jnp.transpose(w1.reshape(E * H, D), (1, 0)).astype(jnp.bfloat16)  # (D, E*H)
    b1_all = b1.reshape(1, E * H).astype(jnp.float32)
    w2_t = jnp.transpose(w2, (0, 2, 1)).astype(jnp.bfloat16)  # (E, H, D): clean MXU feed
    b2_r = b2.reshape(E, 1, D).astype(jnp.float32)
    gates_f = gates.astype(jnp.float32)                       # (B, E): one padded tile

    # Row tile: multiple of 8 sublanes; tm=2048 keeps the per-tile working set
    # (x bf16 + y f32 double-buffered + gates + h_all/o/p/acc intermediates)
    # comfortably under v7x's 32 MiB scoped-VMEM while amortizing the ~0.35 us
    # per-grid-step overhead on v5e/v6e.  The "parallel" axis shards across
    # v7x's 2 TensorCores whenever n_tiles >= 2.
    tm = max(8, min(tm, ((B + 7) // 8) * 8))
    n_tiles = pl.cdiv(B, tm)
    Bp = n_tiles * tm
    if Bp != B:
        x_bf = jnp.pad(x_bf, ((0, Bp - B), (0, 0)))
        gates_f = jnp.pad(gates_f, ((0, Bp - B), (0, 0)))

    flops = 4 * Bp * D * E * H                         # fc1 + fc2 MACs * 2
    transcendentals = Bp * (E * (D + 1) + D)           # exps + reciprocals + final log
    bytes_accessed = (Bp * D * 2 + Bp * D * 4 + Bp * E * 4 +
                      2 * E * H * D * 2 + E * (H + D) * 4)

    kernel = partial(_moe_experts_kernel, num_experts=E, hidden_size=H)
    y = pl.pallas_call(
        kernel,
        out_shape=jax.ShapeDtypeStruct((Bp, D), jnp.float32),
        grid=(n_tiles,),
        in_specs=[
            pl.BlockSpec((tm, D), lambda i: (i, 0)),           # x: row-tiled, bf16
            pl.BlockSpec((tm, E), lambda i: (i, 0)),           # gates: one (tm,E) tile
            pl.BlockSpec((D, E * H), lambda i: (0, 0)),        # fused fc1 weight (resident)
            pl.BlockSpec((1, E * H), lambda i: (0, 0)),        # fc1 bias
            pl.BlockSpec((E, H, D), lambda i: (0, 0, 0)),      # fc2 weights (pre-transposed)
            pl.BlockSpec((E, 1, D), lambda i: (0, 0, 0)),      # fc2 biases
        ],
        out_specs=pl.BlockSpec((tm, D), lambda i: (i, 0)),     # y: lane-dense rows
        compiler_params=pltpu.CompilerParams(
            dimension_semantics=("parallel",)),
        cost_estimate=pl.CostEstimate(
            flops=flops, transcendentals=transcendentals,
            bytes_accessed=bytes_accessed),
    )(x_bf, gates_f, w1_all, b1_all, w2_t, b2_r)
    return y[:B]
    # TODO(synk): with k=2 of E=4, gate-zero experts still burn half the MXU/EUP.
    # Next structural step: sort tokens by expert and use PrefetchScalarGridSpec
    # group offsets (or at minimum an SMEM "expert active" flag + pl.when per
    # expert) to stop paying (E-k)/E wasted compute; scales with E.


# ----------------------------------- JAX glue ------------------------------------
def cv_squared(v):
    # torch: x.float().var() / (x.float().mean()**2 + 1e-10)  (unbiased var, ddof=1)
    eps = 1e-10
    v = v.astype(jnp.float32)
    if v.shape[0] == 1:
        return jnp.zeros(())
    return jnp.var(v, ddof=1) / (jnp.mean(v) ** 2 + eps)


def smoe_forward(x, params, *, k, loss_coef=0.01):
    """Mirrors SMoE.forward with routing='topk', noisy_gating=False, train=True."""
    b, n, d = x.shape
    xf = x.reshape(b * n, d)                           # (b n) d

    # noisy_top_k_gating with noise disabled (noisy_gating=False).  The (B,E=4)
    # matmul is tiny -> plain JAX (XLA fuses it), no extra pallas_call launch.
    logits = jnp.dot(xf, params["w_gate"].T, preferred_element_type=jnp.float32)
    E = params["w_gate"].shape[0]
    kk = min(k + 1, E)
    top_logits, top_idx = jax.lax.top_k(logits, kk)
    top_k_logits = top_logits[:, :k]
    top_k_idx = top_idx[:, :k]
    top_k_gates = jax.nn.softmax(top_k_logits, axis=1)
    B = xf.shape[0]
    rows = jnp.arange(B)[:, None]
    gates = jnp.zeros((B, E), jnp.float32).at[rows, top_k_idx].set(top_k_gates)
    logsoft_gates = jnp.zeros((B, E), jnp.float32).at[rows, top_k_idx].set(
        jax.nn.log_softmax(top_k_logits, axis=1))
    load = (gates > 0).sum(axis=0).astype(jnp.float32)     # _gates_to_load
    importance = gates.sum(axis=0)
    loss = (cv_squared(importance) + cv_squared(load)) * loss_coef

    # Expert MLPs + gate-weighted combine — the Pallas hot path.
    y = moe_experts(xf, gates, params["w1"], params["b1"],
                    params["w2"], params["b2"])
    y = y.reshape(b, n, d)
    # matches PyTorch return (y, loss, importance, load, None/logsoft_gates, 0)
    return y, loss, importance, load, logsoft_gates, 0


def _smoe_ref_y(x, params, k):
    """Pure-JAX f32 reference of the y output (for a loose numeric check)."""
    b, n, d = x.shape
    xf = x.reshape(b * n, d)
    E = params["w_gate"].shape[0]
    logits = xf @ params["w_gate"].T
    top_logits, top_idx = jax.lax.top_k(logits, min(k + 1, E))
    top_k_gates = jax.nn.softmax(top_logits[:, :k], axis=1)
    rows = jnp.arange(xf.shape[0])[:, None]
    gates = jnp.zeros((xf.shape[0], E), jnp.float32).at[rows, top_idx[:, :k]].set(top_k_gates)
    comb = jnp.zeros_like(xf)
    for e in range(E):
        h = jnp.maximum(xf @ params["w1"][e].T + params["b1"][e], 0.0)
        o = h @ params["w2"][e].T + params["b2"][e]
        comb = comb + gates[:, e:e + 1] * jnp.exp(jax.nn.log_softmax(o, axis=1))
    comb = jnp.where(comb == 0.0, EPS_COMBINE, comb)
    return jnp.log(comb).reshape(b, n, d)


# ------------------------------------- main --------------------------------------
if __name__ == "__main__":
    E, D, H, K = 4, 128, 64, 2          # num_experts, input_size, hidden_size, k
    b, n = 2, 8

    key = jax.random.PRNGKey(0)
    kx, kg, k1, k2, k3, k4 = jax.random.split(key, 6)
    params = {
        "w_gate": 0.05 * jax.random.normal(kg, (E, D), jnp.float32),  # Linear(D->E, no bias)
        "w1": 0.05 * jax.random.normal(k1, (E, H, D), jnp.float32),   # per-expert fc1.weight
        "b1": 0.01 * jax.random.normal(k2, (E, H), jnp.float32),      # per-expert fc1.bias
        "w2": 0.05 * jax.random.normal(k3, (E, D, H), jnp.float32),   # per-expert fc2.weight
        "b2": 0.01 * jax.random.normal(k4, (E, D), jnp.float32),      # per-expert fc2.bias
    }
    x = jax.random.normal(kx, (b, n, D), jnp.float32)

    y, loss, importance, load, logsoft_gates, _ = smoe_forward(x, params, k=K)
    jax.block_until_ready((y, loss, importance, load, logsoft_gates))
    assert y.shape == (b, n, D) and importance.shape == (E,) and load.shape == (E,)
    assert bool(jnp.all(jnp.isfinite(y)))

    # Loose check vs. f32 reference (kernel matmuls are bf16 -> small deviation).
    y_ref = _smoe_ref_y(x, params, K)
    assert bool(jnp.allclose(y, y_ref, rtol=5e-2, atol=5e-2)), \
        f"max abs diff {float(jnp.max(jnp.abs(y - y_ref)))}"

    print("KERNEL_OK")
</pallas_src>

<mosaic_0001>
module attributes {stable_mosaic.version = 11 : i64} {
  func.func @_moe_experts_kernel(%arg0: i32, %arg1: memref<16x128xbf16, #tpu.memory_space<vmem>>, %arg2: memref<16x4xf32, #tpu.memory_space<vmem>>, %arg3: memref<128x256xbf16, #tpu.memory_space<vmem>>, %arg4: memref<1x256xf32, #tpu.memory_space<vmem>>, %arg5: memref<4x64x128xbf16, #tpu.memory_space<vmem>>, %arg6: memref<4x1x128xf32, #tpu.memory_space<vmem>>, %arg7: memref<16x128xf32, #tpu.memory_space<vmem>>) attributes {dimension_semantics = [#tpu.dimension_semantics<parallel>], iteration_bounds = array<i64: 1>, scalar_prefetch = 0 : i64, scratch_operands = 0 : i64, tpu.core_type = #tpu.core_type<tc>, window_params = [{transform_indices = @transform_0, window_bounds = array<i64: 16, 128>}, {transform_indices = @transform_1, window_bounds = array<i64: 16, 4>}, {pipeline_mode = #tpu.pipeline_mode<synchronous>, transform_indices = @transform_2, window_bounds = array<i64: 128, 256>}, {pipeline_mode = #tpu.pipeline_mode<synchronous>, transform_indices = @transform_3, window_bounds = array<i64: 1, 256>}, {pipeline_mode = #tpu.pipeline_mode<synchronous>, transform_indices = @transform_4, window_bounds = array<i64: 4, 64, 128>}, {pipeline_mode = #tpu.pipeline_mode<synchronous>, transform_indices = @transform_5, window_bounds = array<i64: 4, 1, 128>}, {transform_indices = @transform_6, window_bounds = array<i64: 16, 128>}]} {
    %c0 = arith.constant 0 : index
    %c0_0 = arith.constant 0 : index
    %0 = vector.load %arg1[%c0, %c0_0] : memref<16x128xbf16, #tpu.memory_space<vmem>>, vector<16x128xbf16>
    %c0_1 = arith.constant 0 : index
    %c0_2 = arith.constant 0 : index
    %1 = vector.load %arg3[%c0_1, %c0_2] : memref<128x256xbf16, #tpu.memory_space<vmem>>, vector<128x256xbf16>
    %cst = arith.constant dense<0.000000e+00> : vector<16x256xf32>
    %2 = tpu.matmul %0, %1, %cst {dimension_numbers = #tpu.dot_dimension_numbers<[1], [0], [0], [1], [0, 0, 1, 1], [], []>} : vector<16x128xbf16>, vector<128x256xbf16>, vector<16x256xf32> -> vector<16x256xf32>
    %c0_3 = arith.constant 0 : index
    %c0_4 = arith.constant 0 : index
    %3 = vector.load %arg4[%c0_3, %c0_4] : memref<1x256xf32, #tpu.memory_space<vmem>>, vector<1x256xf32>
    %4 = vector.broadcast %3 : vector<1x256xf32> to vector<16x256xf32>
    %5 = arith.addf %2, %4 : vector<16x256xf32>
    %cst_5 = arith.constant 0.000000e+00 : f32
    %6 = vector.broadcast %cst_5 : f32 to vector<16x256xf32>
    %7 = arith.maximumf %5, %6 : vector<16x256xf32>
    %8 = arith.truncf %7 : vector<16x256xf32> to vector<16x256xbf16>
    %c0_6 = arith.constant 0 : index
    %c0_7 = arith.constant 0 : index
    %9 = vector.load %arg2[%c0_6, %c0_7] : memref<16x4xf32, #tpu.memory_space<vmem>>, vector<16x4xf32>
    %cst_8 = arith.constant 0.000000e+00 : f32
    %10 = vector.broadcast %cst_8 : f32 to vector<16x128xf32>
    %11 = vector.extract_strided_slice %8 {offsets = [0, 0], sizes = [16, 64], strides = [1, 1]} : vector<16x256xbf16> to vector<16x64xbf16>
    %c0_9 = arith.constant 0 : index
    %c0_10 = arith.constant 0 : index
    %c0_11 = arith.constant 0 : index
    %12 = vector.load %arg5[%c0_9, %c0_10, %c0_11] : memref<4x64x128xbf16, #tpu.memory_space<vmem>>, vector<1x64x128xbf16>
    %13 = vector.shape_cast %12 : vector<1x64x128xbf16> to vector<64x128xbf16>
    %cst_12 = arith.constant dense<0.000000e+00> : vector<16x128xf32>
    %14 = tpu.matmul %11, %13, %cst_12 {dimension_numbers = #tpu.dot_dimension_numbers<[1], [0], [0], [1], [0, 0, 1, 1], [], []>} : vector<16x64xbf16>, vector<64x128xbf16>, vector<16x128xf32> -> vector<16x128xf32>
    %c0_13 = arith.constant 0 : index
    %c0_14 = arith.constant 0 : index
    %c0_15 = arith.constant 0 : index
    %15 = vector.load %arg6[%c0_13, %c0_14, %c0_15] : memref<4x1x128xf32, #tpu.memory_space<vmem>>, vector<1x1x128xf32>
    %16 = vector.shape_cast %15 : vector<1x1x128xf32> to vector<1x128xf32>
    %17 = vector.broadcast %16 : vector<1x128xf32> to vector<16x128xf32>
    %18 = arith.addf %14, %17 : vector<16x128xf32>
    %cst_16 = arith.constant dense<0xFF800000> : vector<16xf32>
    %19 = vector.multi_reduction <maximumf>, %18, %cst_16 [1] : vector<16x128xf32> to vector<16xf32>
    %20 = vector.shape_cast %19 : vector<16xf32> to vector<16x1xf32>
    %21 = vector.broadcast %20 : vector<16x1xf32> to vector<16x128xf32>
    %22 = arith.subf %18, %21 : vector<16x128xf32>
    %23 = math.exp %22 : vector<16x128xf32>
    %cst_17 = arith.constant dense<0.000000e+00> : vector<16xf32>
    %24 = vector.multi_reduction <add>, %23, %cst_17 [1] : vector<16x128xf32> to vector<16xf32>
    %25 = vector.shape_cast %24 : vector<16xf32> to vector<16x1xf32>
    %26 = tpu.reciprocal %25 {approx = true} : vector<16x1xf32> -> vector<16x1xf32>
    %27 = vector.extract_strided_slice %9 {offsets = [0, 0], sizes = [16, 1], strides = [1, 1]} : vector<16x4xf32> to vector<16x1xf32>
    %28 = arith.mulf %27, %26 : vector<16x1xf32>
    %29 = vector.broadcast %28 : vector<16x1xf32> to vector<16x128xf32>
    %30 = arith.mulf %29, %23 : vector<16x128xf32>
    %31 = arith.addf %10, %30 : vector<16x128xf32>
    %32 = vector.extract_strided_slice %8 {offsets = [0, 64], sizes = [16, 64], strides = [1, 1]} : vector<16x256xbf16> to vector<16x64xbf16>
    %c1 = arith.constant 1 : index
    %c0_18 = arith.constant 0 : index
    %c0_19 = arith.constant 0 : index
    %33 = vector.load %arg5[%c1, %c0_18, %c0_19] : memref<4x64x128xbf16, #tpu.memory_space<vmem>>, vector<1x64x128xbf16>
    %34 = vector.shape_cast %33 : vector<1x64x128xbf16> to vector<64x128xbf16>
    %cst_20 = arith.constant dense<0.000000e+00> : vector<16x128xf32>
    %35 = tpu.matmul %32, %34, %cst_20 {dimension_numbers = #tpu.dot_dimension_numbers<[1], [0], [0], [1], [0, 0, 1, 1], [], []>} : vector<16x64xbf16>, vector<64x128xbf16>, vector<16x128xf32> -> vector<16x128xf32>
    %c1_21 = arith.constant 1 : index
    %c0_22 = arith.constant 0 : index
    %c0_23 = arith.constant 0 : index
    %36 = vector.load %arg6[%c1_21, %c0_22, %c0_23] : memref<4x1x128xf32, #tpu.memory_space<vmem>>, vector<1x1x128xf32>
    %37 = vector.shape_cast %36 : vector<1x1x128xf32> to vector<1x128xf32>
    %38 = vector.broadcast %37 : vector<1x128xf32> to vector<16x128xf32>
    %39 = arith.addf %35, %38 : vector<16x128xf32>
    %cst_24 = arith.constant dense<0xFF800000> : vector<16xf32>
    %40 = vector.multi_reduction <maximumf>, %39, %cst_24 [1] : vector<16x128xf32> to vector<16xf32>
    %41 = vector.shape_cast %40 : vector<16xf32> to vector<16x1xf32>
    %42 = vector.broadcast %41 : vector<16x1xf32> to vector<16x128xf32>
    %43 = arith.subf %39, %42 : vector<16x128xf32>
    %44 = math.exp %43 : vector<16x128xf32>
    %cst_25 = arith.constant dense<0.000000e+00> : vector<16xf32>
    %45 = vector.multi_reduction <add>, %44, %cst_25 [1] : vector<16x128xf32> to vector<16xf32>
    %46 = vector.shape_cast %45 : vector<16xf32> to vector<16x1xf32>
    %47 = tpu.reciprocal %46 {approx = true} : vector<16x1xf32> -> vector<16x1xf32>
    %48 = vector.extract_strided_slice %9 {offsets = [0, 1], sizes = [16, 1], strides = [1, 1]} : vector<16x4xf32> to vector<16x1xf32>
    %49 = arith.mulf %48, %47 : vector<16x1xf32>
    %50 = vector.broadcast %49 : vector<16x1xf32> to vector<16x128xf32>
    %51 = arith.mulf %50, %44 : vector<16x128xf32>
    %52 = arith.addf %31, %51 : vector<16x128xf32>
    %53 = vector.extract_strided_slice %8 {offsets = [0, 128], sizes = [16, 64], strides = [1, 1]} : vector<16x256xbf16> to vector<16x64xbf16>
    %c2 = arith.constant 2 : index
    %c0_26 = arith.constant 0 : index
    %c0_27 = arith.constant 0 : index
    %54 = vector.load %arg5[%c2, %c0_26, %c0_27] : memref<4x64x128xbf16, #tpu.memory_space<vmem>>, vector<1x64x128xbf16>
    %55 = vector.shape_cast %54 : vector<1x64x128xbf16> to vector<64x128xbf16>
    %cst_28 = arith.constant dense<0.000000e+00> : vector<16x128xf32>
    %56 = tpu.matmul %53, %55, %cst_28 {dimension_numbers = #tpu.dot_dimension_numbers<[1], [0], [0], [1], [0, 0, 1, 1], [], []>} : vector<16x64xbf16>, vector<64x128xbf16>, vector<16x128xf32> -> vector<16x128xf32>
    %c2_29 = arith.constant 2 : index
    %c0_30 = arith.constant 0 : index
    %c0_31 = arith.constant 0 : index
    %57 = vector.load %arg6[%c2_29, %c0_30, %c0_31] : memref<4x1x128xf32, #tpu.memory_space<vmem>>, vector<1x1x128xf32>
    %58 = vector.shape_cast %57 : vector<1x1x128xf32> to vector<1x128xf32>
    %59 = vector.broadcast %58 : vector<1x128xf32> to vector<16x128xf32>
    %60 = arith.addf %56, %59 : vector<16x128xf32>
    %cst_32 = arith.constant dense<0xFF800000> : vector<16xf32>
    %61 = vector.multi_reduction <maximumf>, %60, %cst_32 [1] : vector<16x128xf32> to vector<16xf32>
    %62 = vector.shape_cast %61 : vector<16xf32> to vector<16x1xf32>
    %63 = vector.broadcast %62 : vector<16x1xf32> to vector<16x128xf32>
    %64 = arith.subf %60, %63 : vector<16x128xf32>
    %65 = math.exp %64 : vector<16x128xf32>
    %cst_33 = arith.constant dense<0.000000e+00> : vector<16xf32>
    %66 = vector.multi_reduction <add>, %65, %cst_33 [1] : vector<16x128xf32> to vector<16xf32>
    %67 = vector.shape_cast %66 : vector<16xf32> to vector<16x1xf32>
    %68 = tpu.reciprocal %67 {approx = true} : vector<16x1xf32> -> vector<16x1xf32>
    %69 = vector.extract_strided_slice %9 {offsets = [0, 2], sizes = [16, 1], strides = [1, 1]} : vector<16x4xf32> to vector<16x1xf32>
    %70 = arith.mulf %69, %68 : vector<16x1xf32>
    %71 = vector.broadcast %70 : vector<16x1xf32> to vector<16x128xf32>
    %72 = arith.mulf %71, %65 : vector<16x128xf32>
    %73 = arith.addf %52, %72 : vector<16x128xf32>
    %74 = vector.extract_strided_slice %8 {offsets = [0, 192], sizes = [16, 64], strides = [1, 1]} : vector<16x256xbf16> to vector<16x64xbf16>
    %c3 = arith.constant 3 : index
    %c0_34 = arith.constant 0 : index
    %c0_35 = arith.constant 0 : index
    %75 = vector.load %arg5[%c3, %c0_34, %c0_35] : memref<4x64x128xbf16, #tpu.memory_space<vmem>>, vector<1x64x128xbf16>
    %76 = vector.shape_cast %75 : vector<1x64x128xbf16> to vector<64x128xbf16>
    %cst_36 = arith.constant dense<0.000000e+00> : vector<16x128xf32>
    %77 = tpu.matmul %74, %76, %cst_36 {dimension_numbers = #tpu.dot_dimension_numbers<[1], [0], [0], [1], [0, 0, 1, 1], [], []>} : vector<16x64xbf16>, vector<64x128xbf16>, vector<16x128xf32> -> vector<16x128xf32>
    %c3_37 = arith.constant 3 : index
    %c0_38 = arith.constant 0 : index
    %c0_39 = arith.constant 0 : index
    %78 = vector.load %arg6[%c3_37, %c0_38, %c0_39] : memref<4x1x128xf32, #tpu.memory_space<vmem>>, vector<1x1x128xf32>
    %79 = vector.shape_cast %78 : vector<1x1x128xf32> to vector<1x128xf32>
    %80 = vector.broadcast %79 : vector<1x128xf32> to vector<16x128xf32>
    %81 = arith.addf %77, %80 : vector<16x128xf32>
    %cst_40 = arith.constant dense<0xFF800000> : vector<16xf32>
    %82 = vector.multi_reduction <maximumf>, %81, %cst_40 [1] : vector<16x128xf32> to vector<16xf32>
    %83 = vector.shape_cast %82 : vector<16xf32> to vector<16x1xf32>
    %84 = vector.broadcast %83 : vector<16x1xf32> to vector<16x128xf32>
    %85 = arith.subf %81, %84 : vector<16x128xf32>
    %86 = math.exp %85 : vector<16x128xf32>
    %cst_41 = arith.constant dense<0.000000e+00> : vector<16xf32>
    %87 = vector.multi_reduction <add>, %86, %cst_41 [1] : vector<16x128xf32> to vector<16xf32>
    %88 = vector.shape_cast %87 : vector<16xf32> to vector<16x1xf32>
    %89 = tpu.reciprocal %88 {approx = true} : vector<16x1xf32> -> vector<16x1xf32>
    %90 = vector.extract_strided_slice %9 {offsets = [0, 3], sizes = [16, 1], strides = [1, 1]} : vector<16x4xf32> to vector<16x1xf32>
    %91 = arith.mulf %90, %89 : vector<16x1xf32>
    %92 = vector.broadcast %91 : vector<16x1xf32> to vector<16x128xf32>
    %93 = arith.mulf %92, %86 : vector<16x128xf32>
    %94 = arith.addf %73, %93 : vector<16x128xf32>
    %cst_42 = arith.constant 0.000000e+00 : f32
    %95 = vector.broadcast %cst_42 : f32 to vector<16x128xf32>
    %96 = arith.cmpf oeq, %94, %95 : vector<16x128xf32>
    %cst_43 = arith.constant 2.22044605E-16 : f32
    %97 = vector.broadcast %cst_43 : f32 to vector<16x128xf32>
    %98 = arith.select %96, %97, %94 : vector<16x128xi1>, vector<16x128xf32>
    %99 = math.log %98 : vector<16x128xf32>
    %c0_44 = arith.constant 0 : index
    %c0_45 = arith.constant 0 : index
    %100 = vector.load %arg7[%c0_44, %c0_45] : memref<16x128xf32, #tpu.memory_space<vmem>>, vector<16x128xf32>
    tpu.vector_store %arg7[%c0_44, %c0_45], %99 {strides = array<i32>} : memref<16x128xf32, #tpu.memory_space<vmem>>, vector<16x128xf32>,
    return
  }
  func.func @transform_0(%arg0: i32) -> (i32, i32) {
    %c0_i32 = arith.constant 0 : i32
    %c0_i32_0 = arith.constant 0 : i32
    return %arg0, %c0_i32 : i32, i32
  }
  func.func @transform_1(%arg0: i32) -> (i32, i32) {
    %c0_i32 = arith.constant 0 : i32
    %c0_i32_0 = arith.constant 0 : i32
    return %arg0, %c0_i32 : i32, i32
  }
  func.func @transform_2(%arg0: i32) -> (i32, i32) {
    %c0_i32 = arith.constant 0 : i32
    %c0_i32_0 = arith.constant 0 : i32
    %c0_i32_1 = arith.constant 0 : i32
    return %c0_i32, %c0_i32_0 : i32, i32
  }
  func.func @transform_3(%arg0: i32) -> (i32, i32) {
    %c0_i32 = arith.constant 0 : i32
    %c0_i32_0 = arith.constant 0 : i32
    %c0_i32_1 = arith.constant 0 : i32
    return %c0_i32, %c0_i32_0 : i32, i32
  }
  func.func @transform_4(%arg0: i32) -> (i32, i32, i32) {
    %c0_i32 = arith.constant 0 : i32
    %c0_i32_0 = arith.constant 0 : i32
    %c0_i32_1 = arith.constant 0 : i32
    %c0_i32_2 = arith.constant 0 : i32
    return %c0_i32, %c0_i32_0, %c0_i32_1 : i32, i32, i32
  }
  func.func @transform_5(%arg0: i32) -> (i32, i32, i32) {
    %c0_i32 = arith.constant 0 : i32
    %c0_i32_0 = arith.constant 0 : i32
    %c0_i32_1 = arith.constant 0 : i32
    %c0_i32_2 = arith.constant 0 : i32
    return %c0_i32, %c0_i32_0, %c0_i32_1 : i32, i32, i32
  }
  func.func @transform_6(%arg0: i32) -> (i32, i32) {
    %c0_i32 = arith.constant 0 : i32
    %c0_i32_0 = arith.constant 0 : i32
    return %arg0, %c0_i32 : i32, i32
  }
}

</mosaic_0001>

<bundles_post_ra>
// kernel: tpu_custom_call.1
= control target key start
LH: loop header
LB: loop body
LE: loop exit
PB: predicated region body
PF: predicated region fallthrough
CT: control target
= control target key end

     0   :  { %11 = vsyncpa [#allocation3], 0  ;;  %s1179_s0 = inlined_call_operand.vmem [shape: bf16[16,128], index: 0, kind: input, shape index: {}]   ;;  %s1180_s1 = inlined_call_operand.vmem [shape: f32[16,4], index: 1, kind: input, shape index: {}]   ;;  %s1181_s2 = inlined_call_operand.hbm [shape: bf16[128,256], index: 2, kind: input, shape index: {}]   ;;  %s1182_s3 = inlined_call_operand.vmem [shape: f32[1,256], index: 3, kind: input, shape index: {}]   ;;  %s1183_s4 = inlined_call_operand.hbm [shape: bf16[4,64,128], index: 4, kind: input, shape index: {}]   ;;  %s1184_s5 = inlined_call_operand.vmem [shape: f32[4,1,128], index: 5, kind: input, shape index: {}]   ;;  %s1185_s6 = inlined_call_operand.hbm [shape: f32[16,128], index: 6, kind: output, shape index: {}]  }
   0x1   :  { %12 = vsyncpa [#allocation6], 0 }
   0x2   :  { %13 = vsyncpa [#allocation4], 0  ;;  %s1001_s21 = smov [#allocation2]   ;;  %s929_s25 = scalar_lea.hbm %s1181_s2, 2048 }
   0x3   :  { %s23_s22 = sshll.u32 %s1001_s21, 4  ;;  %p930_p0 = scmp.ne.s32.totalorder %s1181_s2, %s929_s25  ;;  %s24_s22 = int_to_ptr.vmem [resolvable:$true] %s23_s22 }
   0x4   :  { %p933_p1 = scmp.lt.u32.totalorder %s929_s25, %s1181_s2 }
   0x6   :  { %p935_p2 = pnand %p933_p1, %p930_p0 }
   0x8   :  { %938 = shalt.err (!%p935_p2)
}
   0x9   :  { %s939_s30 = scalar_lea.vmem %s24_s22, 2048  ;;  %p944_p4 = scmp.lt.s32.totalorder %s24_s22, %s24_s22 }
   0xa   :  { %p940_p3 = scmp.ne.s32.totalorder %s24_s22, %s939_s30  ;;  %p945_p5 = scmp.lt.s32.totalorder %s939_s30, %s939_s30 }
   0xc   :  { %p946_p6 = por %p945_p5, %p944_p4 }
   0xe   :  { %p947_p7 = pnand %p946_p6, %p940_p3 }
  0x10   :  { %950 = shalt.err (!%p947_p7)
}
  0x11   :  { %s1002_s7 = smov 128   ;;  %s1003_s8 = smov 8  }
  0x12   :  { %29 = dma.hbm_to_vmem [thread:$0]  %s1181_s2, 2048, %s24_s22, [#allocation3], %s1002_s7, %s1002_s7, %s1003_s8  }
  0x13   :  { %s1004_s11 = smov [#allocation5]   ;;  %s951_s15 = scalar_lea.hbm %s1183_s4, 2048 }
  0x14   :  { %s37_s12 = sshll.u32 %s1004_s11, 4  ;;  %p952_p8 = scmp.ne.s32.totalorder %s1183_s4, %s951_s15  ;;  %s38_s12 = int_to_ptr.vmem [resolvable:$true] %s37_s12 }
  0x15   :  { %p955_p9 = scmp.lt.u32.totalorder %s951_s15, %s1183_s4 }
  0x17   :  { %p957_p10 = pnand %p955_p9, %p952_p8 }
  0x19   :  { %960 = shalt.err (!%p957_p10)
}
  0x1a   :  { %s961_s20 = scalar_lea.vmem %s38_s12, 2048  ;;  %p966_p12 = scmp.lt.s32.totalorder %s38_s12, %s38_s12 }
  0x1b   :  { %p962_p11 = scmp.ne.s32.totalorder %s38_s12, %s961_s20  ;;  %p967_p13 = scmp.lt.s32.totalorder %s961_s20, %s961_s20 }
  0x1d   :  { %p968_p0 = por %p967_p13, %p966_p12 }
  0x1f   :  { %p969_p1 = pnand %p968_p0, %p962_p11 }
  0x21   :  { %972 = shalt.err (!%p969_p1)
}
  0x22   :  { %s1005_s2 = smov 64   ;;  %s1006_s21 = smov 4  }
  0x23   :  { %43 = dma.hbm_to_vmem [thread:$0]  %s1183_s4, 2048, %s38_s12, [#allocation6], %s1005_s2, %s1005_s2, %s1006_s21  }
  0x24   :  { %995 = dma.done.wait [#allocation3], 2048  }
  0x25   :  { %996 = vsyncadd [#allocation3], 4294965248 }
  0x26   :  { %997 = dma.done.wait [#allocation6], 2048  }
  0x27   :  { %998 = vsyncadd [#allocation6], 4294965248  ;;  %v1007_v0 = vmov 0   ;;  %v1008_v1 = vmov 0.0   ;;  %v852_v2 = vld [vmem:[#allocation2 + $0x4] ss:$8 sps:$4 sm:$0xff]   ;;  %v73_v27 = vlaneseq }
  0x28   :  { %201 = vmatprep.mubr.bf16.mxu0 %v1007_v0  ;;  %785 = vmatprep.subr.bf16.mxu1 %v1008_v1  ;;  %v854_v3 = vld [vmem:[#allocation2] ss:$8 sps:$4 sm:$0xff]   ;;  %v855_v4 = vld [vmem:[#allocation2 + $0x14] ss:$8 sps:$4 sm:$0xff]   ;;  %v857_v5 = vld [vmem:[#allocation2 + $0x10] ss:$8 sps:$4 sm:$0xff]  }
  0x29   :  { %846 = vset.pattern.permute.xlu1 %v1007_v0  ;;  %847 = vset.pattern.permute.xlu0 %v1007_v0  ;;  %v858_v6 = vld [vmem:[#allocation2 + $0x24] ss:$8 sps:$4 sm:$0xff]   ;;  %v860_v7 = vld [vmem:[#allocation2 + $0x20] ss:$8 sps:$4 sm:$0xff]   ;;  %v861_v8 = vld [vmem:[#allocation2 + $0x34] ss:$8 sps:$4 sm:$0xff]  }
  0x2a   :  { %169 = vmatprep.subr.bf16.mxu0 %v852_v2  ;;  %v863_v9 = vld [vmem:[#allocation2 + $0x30] ss:$8 sps:$4 sm:$0xff]   ;;  %v864_v10 = vld [vmem:[#allocation2 + $0x44] ss:$8 sps:$4 sm:$0xff]   ;;  %v866_v13 = vld [vmem:[#allocation2 + $0x40] ss:$8 sps:$4 sm:$0xff]  }
  0x2b   :  { %170 = vmatpush1.bf16.msra.mxu0 %v854_v3  ;;  %v877_v11 = vld [vmem:[#allocation5] sm:$0xff]   ;;  %v879_v12 = vld [vmem:[#allocation5 + $0x8] sm:$0xff]   ;;  %v867_v14 = vld [vmem:[#allocation2 + $0x54] ss:$8 sps:$4 sm:$0xff]   ;;  %vm1009_vm0 = vmmov 0   ;;  %v74_v28 = vshrl.u32 %v73_v27, 7 }
  0x2c   :  { %171 = vmatprep.subr.bf16.mxu0 %v855_v4  ;;  %786 = vmatpush3.bf16.msra.mxu1 %v877_v11  ;;  %v869_v15 = vld [vmem:[#allocation2 + $0x50] ss:$8 sps:$4 sm:$0xff]   ;;  %v870_v16 = vld [vmem:[#allocation2 + $0x64] ss:$8 sps:$4 sm:$0xff]   ;;  %v872_v17 = vld [vmem:[#allocation2 + $0x60] ss:$8 sps:$4 sm:$0xff]  }
  0x2d   :  { %787 = vmatprep.subr.bf16.mxu1 %v1008_v1  ;;  %v873_v18 = vld [vmem:[#allocation2 + $0x74] ss:$8 sps:$4 sm:$0xff]   ;;  %v875_v19 = vld [vmem:[#allocation2 + $0x70] ss:$8 sps:$4 sm:$0xff]   ;;  %v876_v20 = vld [vmem:[%s1179_s0] sm:$0xff]   ;;  %793 = vmatprep.mubr.msk.bf16.mxu1 %vm1009_vm0, %v1008_v1  ;;  %v75_v29 = vsub.s32 0, %v74_v28 }
  0x2e   :  { %v878_v21 = vld [vmem:[#allocation5 + $0x40] sm:$0xff]   ;;  %v880_v22 = vld [vmem:[#allocation5 + $0x48] sm:$0xff]   ;;  %v881_v23 = vld [vmem:[#allocation5 + $0x10] sm:$0xff]   ;;  %v79_v31 = vsub.s32 1, %v74_v28  ;;  %vm259_vm1 = vcmask 523264  }
  0x2f   :  { %172 = vmatpush1.bf16.msra.mxu0 %v857_v5  ;;  %v882_v24 = vld [vmem:[#allocation5 + $0x50] sm:$0xff]   ;;  %v883_v25 = vld [vmem:[#allocation5 + $0x18] sm:$0xff]   ;;  %v71_v30 = vld [vmem:[%s1182_s3] sm:$0x3] }
  0x30   :  { %173 = vmatprep.subr.bf16.mxu0 %v858_v6  ;;  %788 = vmatpush3.bf16.msra.mxu1 %v879_v12  ;;  %v884_v26 = vld [vmem:[#allocation5 + $0x58] sm:$0xff]   ;;  %v76_v32 = vrot.slane %v71_v30, %v75_v29  ;;  %v80_v33 = vrot.slane %v71_v30, %v79_v31  ;;  %v885_v46 = vld [vmem:[#allocation5 + $0x20] sm:$0xff]   ;;  %v886_v49 = vld [vmem:[#allocation5 + $0x28] sm:$0xff]  }
  0x31   :  { %789 = vmatprep.subr.bf16.mxu1 %v1008_v1  ;;  %v887_v50 = vld [vmem:[#allocation5 + $0x30] sm:$0xff]   ;;  %v888_v51 = vld [vmem:[#allocation5 + $0x38] sm:$0xff]   ;;  %v889_v52 = vld [vmem:[#allocation5 + $0x60] sm:$0xff]  }
  0x32   :  { %v890_v54 = vld [vmem:[#allocation5 + $0x68] sm:$0xff]   ;;  %v891_v55 = vld [vmem:[#allocation5 + $0x70] sm:$0xff]   ;;  %v892_v56 = vld [vmem:[#allocation5 + $0x78] sm:$0xff]  }
  0x33   :  { %174 = vmatpush1.bf16.msra.mxu0 %v860_v7  ;;  %v738_v58 = vld [vmem:[%s1184_s5] ss:$0 sm:$0xff] }
  0x34   :  { %175 = vmatprep.subr.bf16.mxu0 %v861_v8  ;;  %790 = vmatpush3.bf16.msra.mxu1 %v881_v23  ;;  %v745_v8 = vld [vmem:[%s1184_s5 + $0x1] ss:$0 sm:$0xff] }
  0x35   :  { %791 = vmatprep.subr.bf16.mxu1 %v1008_v1 }
  0x37   :  { %176 = vmatpush1.bf16.msra.mxu0 %v863_v9 }
  0x38   :  { %177 = vmatprep.subr.bf16.mxu0 %v864_v10  ;;  %792 = vmatpush3.bf16.msra.mxu1 %v883_v25 }
  0x39   :  { %797 = vmatprep.subr.bf16.mxu1 %v1008_v1 }
  0x3b   :  { %178 = vmatpush1.bf16.msra.mxu0 %v866_v13 }
  0x3c   :  { %179 = vmatprep.subr.bf16.mxu0 %v867_v14 }
  0x3f   :  { %180 = vmatpush1.bf16.msra.mxu0 %v869_v15  ;;  %v759_v15 = vld [vmem:[%s1184_s5 + $0x3] ss:$0 sm:$0xff] }
  0x40   :  { %181 = vmatprep.subr.bf16.mxu0 %v870_v16 }
  0x43   :  { %182 = vmatpush1.bf16.msra.mxu0 %v872_v17 }
  0x44   :  { %183 = vmatprep.subr.bf16.mxu0 %v873_v18 }
  0x47   :  { %184 = vmatpush1.bf16.msra.mxu0 %v875_v19 }
  0x48   :  { %809 = vmatprep.subr.bf16.mxu0 %v1008_v1 }
  0x4a   :  { %202 = vmatmul.mubr.bf16.vlgmr.msra.gmra.mrb[0].mxu0 %v876_v20 }
  0x4b   :  { %810 = vmatpush3.bf16.msra.mxu0 %v878_v21  ;;  %817 = vmatprep.mubr.msk.bf16.mxu0 %vm1009_vm0, %v1008_v1 }
  0x4c   :  { %811 = vmatprep.subr.bf16.mxu0 %v1008_v1 }
  0x4f   :  { %812 = vmatpush3.bf16.msra.mxu0 %v880_v22 }
  0x50   :  { %813 = vmatprep.subr.bf16.mxu0 %v1008_v1 }
  0x53   :  { %814 = vmatpush3.bf16.msra.mxu0 %v882_v24 }
  0x54   :  { %815 = vmatprep.subr.bf16.mxu0 %v1008_v1 }
  0x57   :  { %816 = vmatpush3.bf16.msra.mxu0 %v884_v26 }
 0x11d   :  { %v203_v34 = vpop.f32.mrb[0].mxu0 }
 0x11e   :  { %v204_v35 = vadd.f32 %v203_v34, %v76_v32  ;;  %v205_v36 = vpop.f32.mrb[1].mxu0 }
 0x11f   :  { %v206_v37 = vadd.f32 %v205_v36, %v80_v33  ;;  %v207_v38 = vpop.f32.mrb[2].mxu0 }
 0x120   :  { %v208_v39 = vadd.f32 %v207_v38, %v76_v32  ;;  %v209_v40 = vpop.f32.mrb[3].mxu0  ;;  %v212_v42 = vmax.f32 %v204_v35, 0.0 }
 0x121   :  { %v210_v41 = vadd.f32 %v209_v40, %v80_v33  ;;  %v213_v44 = vmax.f32 %v206_v37, 0.0 }
 0x122   :  { %v214_v43 = vmax.f32 %v208_v39, 0.0 }
 0x123   :  { %v215_v45 = vmax.f32 %v210_v41, 0.0 }
 0x124   :  { %v216_v47 = vpack.c.bf16 %v214_v43, %v212_v42 }
 0x125   :  { %v217_v48 = vpack.c.bf16 %v215_v45, %v213_v44 }
 0x126   :  { %354 = vrot.lane.b32.xlu0 %v216_v47, %s1005_s2  ;;  %794 = vmatmul.mubr.msk.bf16.vlgmr.msra.gmra.mrb[0].mxu1 %vm259_vm1, %v216_v47 }
 0x127   :  { %818 = vmatmul.mubr.msk.bf16.vlgmr.msra.gmra.mrb[4].mxu0 %vm259_vm1, %v217_v48  ;;  %798 = vmatpush3.bf16.msra.mxu1 %v885_v46 }
 0x128   :  { %799 = vmatprep.subr.bf16.mxu1 %v1008_v1  ;;  %805 = vmatprep.mubr.msk.bf16.mxu1 %vm1009_vm0, %v1008_v1 }
 0x12a   :  { %591 = vrot.lane.b32.xlu0 %v217_v48, %s1005_s2 }
 0x12b   :  { %800 = vmatpush3.bf16.msra.mxu1 %v886_v49 }
 0x12c   :  { %801 = vmatprep.subr.bf16.mxu1 %v1008_v1 }
 0x12f   :  { %802 = vmatpush3.bf16.msra.mxu1 %v887_v50 }
 0x130   :  { %803 = vmatprep.subr.bf16.mxu1 %v1008_v1 }
 0x133   :  { %804 = vmatpush3.bf16.msra.mxu1 %v888_v51 }
 0x134   :  { %821 = vmatprep.subr.bf16.mxu1 %v1008_v1 }
 0x198   :  { %v355_v53 = vpop.permute.xlu0 %354 }
 0x199   :  { %806 = vmatmul.mubr.msk.bf16.vlgmr.msra.gmra.mrb[4].mxu1 %vm259_vm1, %v355_v53 }
 0x19a   :  { %822 = vmatpush3.bf16.msra.mxu1 %v889_v52  ;;  %829 = vmatprep.mubr.msk.bf16.mxu1 %vm1009_vm0, %v1008_v1 }
 0x19b   :  { %823 = vmatprep.subr.bf16.mxu1 %v1008_v1 }
 0x19c   :  { %v592_v57 = vpop.permute.xlu0 %591 }
 0x19e   :  { %824 = vmatpush3.bf16.msra.mxu1 %v890_v54 }
 0x19f   :  { %825 = vmatprep.subr.bf16.mxu1 %v1008_v1 }
 0x1a2   :  { %826 = vmatpush3.bf16.msra.mxu1 %v891_v55 }
 0x1a3   :  { %827 = vmatprep.subr.bf16.mxu1 %v1008_v1  ;;  %v752_v1 = vld [vmem:[%s1184_s5 + $0x2] ss:$0 sm:$0xff] }
 0x1a6   :  { %828 = vmatpush3.bf16.msra.mxu1 %v892_v56  ;;  %v218_v56 = vld [vmem:[%s1180_s1] sm:$0xff] }
 0x1a9   :  { %830 = vmatmul.mubr.msk.bf16.vlgmr.msra.gmra.mrb[8].mxu1 %vm259_vm1, %v592_v57 }
 0x1f9   :  { %v297_v59 = vpop.f32.mrb[0].mxu1 }
 0x1fa   :  { %v298_v60 = vadd.f32 %v738_v58, %v297_v59  ;;  %v795_v61 = vpop.f32.mrb[1].mxu1  ;;  %v534_v62 = vpop.f32.mrb[4].mxu0 }
 0x1fb   :  { %v300_v63 = vpop.f32.mrb[2].mxu1  ;;  %v819_v0 = vpop.f32.mrb[5].mxu0  ;;  %v535_v6 = vadd.f32 %v752_v1, %v534_v62  ;;  %v1010_v61 = vmov 2  }
 0x1fc   :  { %v537_v2 = vpop.f32.mrb[6].mxu0  ;;  %304 = vmax.xlane.f32.xlu1 %v298_v60  ;;  %v796_v3 = vpop.f32.mrb[3].mxu1  ;;  %v301_v5 = vadd.f32 %v738_v58, %v300_v63  ;;  %v219_v0 = vld [vmem:[%s1180_s1 + $0x8] sm:$0xff]  ;;  %s1013_s1 = smov [#allocation7]  }
 0x1fd   :  { %v820_v4 = vpop.f32.mrb[7].mxu0  ;;  %v538_v7 = vadd.f32 %v752_v1, %v537_v2  ;;  %v1011_v1 = vmov 1   ;;  %s708_s14 = sshll.u32 %s1013_s1, 4  ;;  %s709_s14 = int_to_ptr.vmem [resolvable:$true] %s708_s14 }
 0x1fe   :  { %s973_s15 = scalar_lea.vmem %s709_s14, 256  ;;  %p978_p3 = scmp.lt.s32.totalorder %s709_s14, %s709_s14 }
 0x1ff   :  { %p974_p2 = scmp.ne.s32.totalorder %s709_s14, %s973_s15  ;;  %p979_p4 = scmp.lt.s32.totalorder %s973_s15, %s973_s15 }
 0x200   :  { %306 = vmax.xlane.f32.xlu1 %v301_v5 }
 0x201   :  { %p980_p5 = por %p979_p4, %p978_p3 }
 0x203   :  { %p981_p6 = pnand %p980_p5, %p974_p2 }
 0x204   :  { %541 = vmax.xlane.f32.xlu1 %v535_v6 }
 0x208   :  { %543 = vmax.xlane.f32.xlu1 %v538_v7 }
 0x26c   :  { %v417_v9 = vpop.f32.mrb[4].mxu1 }
 0x26d   :  { %v418_v10 = vadd.f32 %v745_v8, %v417_v9  ;;  %v807_v11 = vpop.f32.mrb[5].mxu1 }
 0x26e   :  { %v420_v12 = vpop.f32.mrb[6].mxu1 }
 0x26f   :  { %v421_v13 = vadd.f32 %v745_v8, %v420_v12  ;;  %424 = vmax.xlane.f32.xlu0 %v418_v10  ;;  %v808_v14 = vpop.f32.mrb[7].mxu1 }
 0x271   :  { %426 = vmax.xlane.f32.xlu1 %v421_v13 }
 0x27c   :  { %v654_v16 = vpop.f32.mrb[8].mxu1 }
 0x27d   :  { %v655_v17 = vadd.f32 %v759_v15, %v654_v16  ;;  %v831_v18 = vpop.f32.mrb[9].mxu1 }
 0x27e   :  { %v657_v19 = vpop.f32.mrb[10].mxu1 }
 0x27f   :  { %661 = vmax.xlane.f32.xlu1 %v655_v17  ;;  %v832_v20 = vpop.f32.mrb[11].mxu1  ;;  %v658_v21 = vadd.f32 %v759_v15, %v657_v19 }
 0x283   :  { %663 = vmax.xlane.f32.xlu1 %v658_v21 }
 0x289   :  { %v305_v22 = vpop.xlane.xlu1 %304 }
 0x28a   :  { %v308_v23 = vsub.f32 %v298_v60, %v305_v22 }
 0x28c   :  { %v310_v24 = vmul.f32 1.442695, %v308_v23 }
 0x28d   :  { %v307_v25 = vpop.xlane.xlu1 %306 }
 0x28e   :  { %893 = vpow2.f32 %v310_v24  ;;  %v309_v26 = vsub.f32 %v301_v5, %v307_v25 }
 0x290   :  { %v312_v30 = vmul.f32 1.442695, %v309_v26 }
 0x291   :  { %v542_v27 = vpop.xlane.xlu1 %541 }
 0x292   :  { %v545_v28 = vsub.f32 %v535_v6, %v542_v27  ;;  %v1012_v6 = vmov 3  }
 0x294   :  { %v547_v29 = vmul.f32 1.442695, %v545_v28 }
 0x295   :  { %v544_v31 = vpop.xlane.xlu1 %543 }
 0x296   :  { %895 = vpow2.f32 %v547_v29  ;;  %v546_v32 = vsub.f32 %v538_v7, %v544_v31 }
 0x297   :  { %897 = vpow2.f32 %v312_v30 }
 0x298   :  { %v1126_v33 = vpop.eup %893  ;;  %v549_v34 = vmul.f32 1.442695, %v546_v32 }
 0x299   :  { %314 = vadd.xlane.f32.xlu1 %v1126_v33 }
 0x29a   :  { %899 = vpow2.f32 %v549_v34 }
 0x2a0   :  { %v1129_v35 = vpop.eup %895 }
 0x2a1   :  { %551 = vadd.xlane.f32.xlu1 %v1129_v35  ;;  %v1132_v36 = vpop.eup %897 }
 0x2a4   :  { %v1134_v37 = vpop.eup %899 }
 0x2a5   :  { %553 = vadd.xlane.f32.xlu0 %v1134_v37  ;;  %316 = vadd.xlane.f32.xlu1 %v1132_v36 }
 0x2fc   :  { %v425_v38 = vpop.xlane.xlu0 %424 }
 0x2fd   :  { %v428_v39 = vsub.f32 %v418_v10, %v425_v38 }
 0x2fe   :  { %v427_v40 = vpop.xlane.xlu1 %426 }
 0x2ff   :  { %v430_v41 = vmul.f32 1.442695, %v428_v39  ;;  %v429_v42 = vsub.f32 %v421_v13, %v427_v40 }
 0x301   :  { %901 = vpow2.f32 %v430_v41  ;;  %v432_v43 = vmul.f32 1.442695, %v429_v42 }
 0x303   :  { %903 = vpow2.f32 %v432_v43 }
 0x30b   :  { %v1138_v44 = vpop.eup %901 }
 0x30c   :  { %v662_v45 = vpop.xlane.xlu1 %661  ;;  %434 = vadd.xlane.f32.xlu1 %v1138_v44 }
 0x30d   :  { %v1141_v46 = vpop.eup %903  ;;  %v665_v47 = vsub.f32 %v655_v17, %v662_v45 }
 0x30e   :  { %436 = vadd.xlane.f32.xlu0 %v1141_v46 }
 0x30f   :  { %v667_v48 = vmul.f32 1.442695, %v665_v47 }
 0x310   :  { %v664_v49 = vpop.xlane.xlu1 %663 }
 0x311   :  { %905 = vpow2.f32 %v667_v48  ;;  %v666_v50 = vsub.f32 %v658_v21, %v664_v49 }
 0x313   :  { %v669_v51 = vmul.f32 1.442695, %v666_v50 }
 0x315   :  { %907 = vpow2.f32 %v669_v51 }
 0x31b   :  { %v1144_v52 = vpop.eup %905 }
 0x31c   :  { %671 = vadd.xlane.f32.xlu1 %v1144_v52 }
 0x31f   :  { %v1147_v53 = vpop.eup %907 }
 0x320   :  { %673 = vadd.xlane.f32.xlu0 %v1147_v53 }
 0x326   :  { %v315_v54 = vpop.xlane.xlu1 %314 }
 0x327   :  { %909 = vrcp.f32 %v315_v54 }
 0x32e   :  { %v552_v55 = vpop.xlane.xlu1 %551 }
 0x32f   :  { %911 = vrcp.f32 %v552_v55 }
 0x331   :  { %v910_v57 = vpop.eup %909 }
 0x332   :  { %v554_v58 = vpop.xlane.xlu0 %553  ;;  %v317_v59 = vpop.xlane.xlu1 %316  ;;  %v320_v60 = vmul.f32 %v910_v57, %v218_v56 }
 0x333   :  { %913 = vrcp.f32 %v554_v58 }
 0x334   :  { %915 = vrcp.f32 %v317_v59  ;;  %324 = vperm.xlu1 %846, %v320_v60  }
 0x338   :  { %848 = vset.pattern.permute.xlu1 %v1010_v61 }
 0x339   :  { %v912_v62 = vpop.eup %911 }
 0x33a   :  { %v557_v63 = vmul.f32 %v912_v62, %v218_v56 }
 0x33c   :  { %561 = vperm.xlu1 %848, %v557_v63  }
 0x33d   :  { %v914_v2 = vpop.eup %913 }
 0x33e   :  { %v916_v3 = vpop.eup %915  ;;  %v558_v4 = vmul.f32 %v914_v2, %v219_v0 }
 0x33f   :  { %v321_v5 = vmul.f32 %v916_v3, %v219_v0 }
 0x340   :  { %566 = vperm.xlu1 %848, %v558_v4  }
 0x341   :  { %329 = vperm.xlu0 %847, %v321_v5  }
 0x344   :  { %849 = vset.pattern.permute.xlu1 %v1011_v1 }
 0x345   :  { %851 = vset.pattern.permute.xlu0 %v1012_v6 }
 0x399   :  { %v435_v7 = vpop.xlane.xlu1 %434 }
 0x39a   :  { %917 = vrcp.f32 %v435_v7 }
 0x39b   :  { %v437_v8 = vpop.xlane.xlu0 %436 }
 0x39c   :  { %919 = vrcp.f32 %v437_v8 }
 0x3a4   :  { %v918_v9 = vpop.eup %917 }
 0x3a5   :  { %v440_v10 = vmul.f32 %v918_v9, %v218_v56 }
 0x3a6   :  { %v920_v11 = vpop.eup %919 }
 0x3a7   :  { %444 = vperm.xlu1 %849, %v440_v10   ;;  %v441_v13 = vmul.f32 %v920_v11, %v219_v0 }
 0x3a9   :  { %v672_v12 = vpop.xlane.xlu1 %671 }
 0x3aa   :  { %921 = vrcp.f32 %v672_v12 }
 0x3ab   :  { %449 = vperm.xlu1 %849, %v441_v13  }
 0x3ad   :  { %v674_v14 = vpop.xlane.xlu0 %673 }
 0x3ae   :  { %923 = vrcp.f32 %v674_v14 }
 0x3af   :  { %850 = vset.pattern.permute.xlu1 %v1012_v6 }
 0x3b3   :  { %v325_v19 = vpop.permute.xlu1 %324 }
 0x3b4   :  { %v922_v15 = vpop.eup %921  ;;  %v332_v25 = vmul.f32 %v1126_v33, %v325_v19 }
 0x3b5   :  { %v677_v16 = vmul.f32 %v922_v15, %v218_v56 }
 0x3b7   :  { %681 = vperm.xlu1 %850, %v677_v16  }
 0x3b8   :  { %v924_v17 = vpop.eup %923 }
 0x3b9   :  { %v678_v18 = vmul.f32 %v924_v17, %v219_v0 }
 0x3bb   :  { %686 = vperm.xlu1 %850, %v678_v18   ;;  %v562_v20 = vpop.permute.xlu1 %561 }
 0x3bc   :  { %v569_v29 = vmul.f32 %v1129_v35, %v562_v20 }
 0x3bf   :  { %v567_v21 = vpop.permute.xlu1 %566 }
 0x3c0   :  { %v330_v26 = vpop.permute.xlu0 %329  ;;  %v570_v39 = vmul.f32 %v1134_v37, %v567_v21 }
 0x3c1   :  { %v333_v30 = vmul.f32 %v1132_v36, %v330_v26 }
 0x426   :  { %v445_v22 = vpop.permute.xlu1 %444 }
 0x427   :  { %v452_v23 = vmul.f32 %v1138_v44, %v445_v22 }
 0x429   :  { %v454_v27 = vadd.f32 %v452_v23, %v332_v25 }
 0x42a   :  { %v450_v24 = vpop.permute.xlu1 %449 }
 0x42b   :  { %v453_v28 = vmul.f32 %v1141_v46, %v450_v24  ;;  %v571_v34 = vadd.f32 %v569_v29, %v454_v27 }
 0x42d   :  { %v455_v32 = vadd.f32 %v453_v28, %v333_v30 }
 0x42f   :  { %v572_v42 = vadd.f32 %v570_v39, %v455_v32 }
 0x436   :  { %v682_v31 = vpop.permute.xlu1 %681 }
 0x437   :  { %v689_v38 = vmul.f32 %v1144_v52, %v682_v31 }
 0x439   :  { %v691_v40 = vadd.f32 %v689_v38, %v571_v34 }
 0x43a   :  { %v687_v41 = vpop.permute.xlu1 %686 }
 0x43b   :  { %vm693_vm2 = vcmp.eq.f32.partialorder %v691_v40, 0.0  ;;  %v690_v33 = vmul.f32 %v1147_v53, %v687_v41 }
 0x43c   :  { %v695_v43 = vsel %vm693_vm2, 2.220446e-16, %v691_v40 }
 0x43d   :  { %925 = vlog2.f32 %v695_v43  ;;  %v692_v44 = vadd.f32 %v690_v33, %v572_v42 }
 0x43f   :  { %vm694_vm3 = vcmp.eq.f32.partialorder %v692_v44, 0.0 }
 0x440   :  { %v696_v35 = vsel %vm694_vm3, 2.220446e-16, %v692_v44 }
 0x441   :  { %927 = vlog2.f32 %v696_v35 }
 0x447   :  { %v926_v36 = vpop.eup %925 }
 0x448   :  { %v698_v45 = vmul.f32 0.6931472, %v926_v36 }
 0x44a   :  { %701 = vst [vmem:[#allocation7] sm:$0xff] %v698_v45 }
 0x44b   :  { %v928_v46 = vpop.eup %927 }
 0x44c   :  { %v700_v47 = vmul.f32 0.6931472, %v928_v46 }
 0x44e   :  { %702 = vst [vmem:[#allocation7 + $0x8] sm:$0xff] %v700_v47 }
 0x44f   :  { %984 = shalt.err (!%p981_p6)
}
 0x450   :  { %s985_s18 = scalar_lea.hbm %s1185_s6, 256 }
 0x451   :  { %p986_p7 = scmp.ne.s32.totalorder %s1185_s6, %s985_s18  ;;  %p989_p8 = scmp.lt.u32.totalorder %s985_s18, %s1185_s6 }
 0x453   :  { %p991_p9 = pnand %p989_p8, %p986_p7 }
 0x455   :  { %994 = shalt.err (!%p991_p9)
}
 0x456   :  { %714 = dma.vmem_to_hbm [thread:$0]  %s709_s14, 256, %s1185_s6, [#allocation4], %s1002_s7, %s1002_s7, %s1003_s8  }
 0x457   :  { %999 = dma.done.wait [#allocation4], 256  }
 0x458   :  { %1000 = vsyncadd [#allocation4], 4294967040 }
 0x459   :  { %718 = vsyncpa [#allocation3], 1 }
 0x45a   :  { %719 = vsyncpa [#allocation6], 1 }
 0x45b   :  { %720 = vsyncpa [#allocation4], 1 }

</bundles_post_ra>
